<compile_context>
chip_gen: v7x
topology: tpu7x:2x2x1
jax: 0.10.0
libtpu: 0.0.40
codegen_flags: <defaults>
</compile_context>

<pallas_src>
import jax
import jax.numpy as jnp
from jax.experimental import pallas as pl
from jax.experimental.pallas import tpu as pltpu


def _round_up(n: int, m: int) -> int:
    return ((n + m - 1) // m) * m


def _time_embed_kernel(x_ref, w_ref, b_ref, o_ref):
    """x: (TB, 4), w: (4, Wp) block-diagonal rows, b: (1, Wp), o: (TB, Wp)."""
    x = x_ref[...].astype(jnp.float32)
    w = w_ref[...].astype(jnp.float32)
    # Four broadcast FMA strips on the VPU (outer-product style), fp32 accumulation.
    acc = x[:, 0:1] * w[0:1, :]
    acc = acc + x[:, 1:2] * w[1:2, :]
    acc = acc + x[:, 2:3] * w[2:3, :]
    acc = acc + x[:, 3:4] * w[3:4, :]
    acc = acc + b_ref[...].astype(jnp.float32)
    o_ref[...] = acc.astype(o_ref.dtype)


def build_fused_params(weights, biases, dtype=jnp.float32):
    """Fuse 4x nn.Linear(1, E) params into a (4, Wp) row-weight and (1, Wp) bias.

    Row i holds weights[i] in columns [i*E, (i+1)*E) and zeros elsewhere; the width is
    lane-padded to a multiple of 128. Call once at init time (hoisted out of the forward).
    """
    E = weights[0].shape[0]
    W = 4 * E
    Wp = max(128, _round_up(W, 128))
    w_fused = jnp.zeros((4, Wp), dtype)
    for i in range(4):
        w_fused = w_fused.at[i, i * E:(i + 1) * E].set(weights[i][:, 0].astype(dtype))
    b_fused = jnp.zeros((1, Wp), dtype)
    b_fused = b_fused.at[0, :W].set(jnp.concatenate([b.astype(dtype) for b in biases]))
    return w_fused, b_fused


def _choose_block_b(batch: int, wp: int, vmem_budget_bytes: int = 8 << 20) -> int:
    # Dominant VMEM cost: double-buffered (TB, Wp) f32 output tile + (TB, 4) input tile.
    per_row = 2 * (wp * 4 + 4 * 4)
    tb = max(8, min(vmem_budget_bytes // per_row, 1024, _round_up(batch, 8)))
    return (tb // 8) * 8


def time_point_embedding(x, w_fused, b_fused, *, embed_dim, block_b=None, out_dtype=None):
    """x: (B, 4) -> (B, 4*embed_dim), matching the PyTorch TimePointEmbedding.forward."""
    B, F = x.shape
    assert F == 4, "TimePointEmbedding expects 4 scalar features per row"
    Wp = w_fused.shape[1]
    W = 4 * embed_dim
    if out_dtype is None:
        out_dtype = x.dtype  # pass jnp.bfloat16 here to halve HBM writeback if tolerated

    tb = block_b if block_b is not None else _choose_block_b(B, Wp)
    Bp = _round_up(B, tb)
    xp = x if Bp == B else jnp.pad(x, ((0, Bp - B), (0, 0)))

    out_itemsize = jnp.dtype(out_dtype).itemsize
    cost = pl.CostEstimate(
        flops=8 * Bp * Wp,
        transcendentals=0,
        bytes_accessed=Bp * 4 * x.dtype.itemsize + 5 * Wp * 4 + Bp * Wp * out_itemsize,
    )

    out_padded = pl.pallas_call(
        _time_embed_kernel,
        out_shape=jax.ShapeDtypeStruct((Bp, Wp), out_dtype),
        grid=(Bp // tb,),
        in_specs=[
            pl.BlockSpec((tb, 4), lambda i: (i, 0)),   # batch-tiled input (last dim = full 4)
            pl.BlockSpec((4, Wp), lambda i: (0, 0)),   # VMEM-resident fused weight
            pl.BlockSpec((1, Wp), lambda i: (0, 0)),   # VMEM-resident fused bias
        ],
        out_specs=pl.BlockSpec((tb, Wp), lambda i: (i, 0)),
        compiler_params=pltpu.CompilerParams(dimension_semantics=("parallel",)),
        cost_estimate=cost,
    )(xp, w_fused, b_fused)

    # Drop batch padding and lane padding (Wp -> 4*embed_dim).
    return out_padded[:B, :W]


def reference_forward(x, weights, biases):
    # Pure-JAX reference mirroring the PyTorch forward exactly.
    outs = []
    for i in range(4):
        xi = x[:, i:i + 1]                          # (B, 1)
        outs.append(xi @ weights[i].T + biases[i])  # (B, E)
    return jnp.concatenate(outs, axis=-1)


if __name__ == "__main__":
    key = jax.random.PRNGKey(0)
    B = 8   # batch
    E = 8   # embed_dim (each *_dim = 1, as implied by the forward's x[:, i:i+1] slicing)

    keys = jax.random.split(key, 9)
    x = jax.random.normal(keys[0], (B, 4), dtype=jnp.float32)

    # nn.Linear(1, E): weight (E, 1), bias (E,)
    weights = [jax.random.normal(keys[1 + i], (E, 1), dtype=jnp.float32) * 0.5 for i in range(4)]
    biases = [jax.random.normal(keys[5 + i], (E,), dtype=jnp.float32) * 0.1 for i in range(4)]

    # One-time fused-parameter construction (hoisted out of the per-call path).
    w_fused, b_fused = build_fused_params(weights, biases)

    fwd = jax.jit(time_point_embedding,
                  static_argnames=("embed_dim", "block_b", "out_dtype"))
    out = fwd(x, w_fused, b_fused, embed_dim=E)
    out = jax.block_until_ready(out)

    ref = reference_forward(x, weights, biases)
    assert out.shape == (B, 4 * E), out.shape
    assert jnp.allclose(out, ref, atol=1e-5, rtol=1e-5), "mismatch vs reference"

    print("KERNEL_OK")
</pallas_src>

<mosaic_0001>
module attributes {stable_mosaic.version = 11 : i64} {
  func.func @_time_embed_kernel(%arg0: i32, %arg1: memref<8x4xf32, #tpu.memory_space<vmem>>, %arg2: memref<4x128xf32, #tpu.memory_space<vmem>>, %arg3: memref<1x128xf32, #tpu.memory_space<vmem>>, %arg4: memref<8x128xf32, #tpu.memory_space<vmem>>) attributes {dimension_semantics = [#tpu.dimension_semantics<parallel>], iteration_bounds = array<i64: 1>, scalar_prefetch = 0 : i64, scratch_operands = 0 : i64, tpu.core_type = #tpu.core_type<tc>, window_params = [{transform_indices = @transform_0, window_bounds = array<i64: 8, 4>}, {pipeline_mode = #tpu.pipeline_mode<synchronous>, transform_indices = @transform_1, window_bounds = array<i64: 4, 128>}, {pipeline_mode = #tpu.pipeline_mode<synchronous>, transform_indices = @transform_2, window_bounds = array<i64: 1, 128>}, {transform_indices = @transform_3, window_bounds = array<i64: 8, 128>}]} {
    %c0 = arith.constant 0 : index
    %c0_0 = arith.constant 0 : index
    %0 = vector.load %arg1[%c0, %c0_0] : memref<8x4xf32, #tpu.memory_space<vmem>>, vector<8x4xf32>
    %c0_1 = arith.constant 0 : index
    %c0_2 = arith.constant 0 : index
    %1 = vector.load %arg2[%c0_1, %c0_2] : memref<4x128xf32, #tpu.memory_space<vmem>>, vector<4x128xf32>
    %2 = vector.extract_strided_slice %0 {offsets = [0, 0], sizes = [8, 1], strides = [1, 1]} : vector<8x4xf32> to vector<8x1xf32>
    %3 = vector.extract_strided_slice %1 {offsets = [0, 0], sizes = [1, 128], strides = [1, 1]} : vector<4x128xf32> to vector<1x128xf32>
    %4 = vector.broadcast %2 : vector<8x1xf32> to vector<8x128xf32>
    %5 = vector.broadcast %3 : vector<1x128xf32> to vector<8x128xf32>
    %6 = arith.mulf %4, %5 : vector<8x128xf32>
    %7 = vector.extract_strided_slice %0 {offsets = [0, 1], sizes = [8, 1], strides = [1, 1]} : vector<8x4xf32> to vector<8x1xf32>
    %8 = vector.extract_strided_slice %1 {offsets = [1, 0], sizes = [1, 128], strides = [1, 1]} : vector<4x128xf32> to vector<1x128xf32>
    %9 = vector.broadcast %7 : vector<8x1xf32> to vector<8x128xf32>
    %10 = vector.broadcast %8 : vector<1x128xf32> to vector<8x128xf32>
    %11 = arith.mulf %9, %10 : vector<8x128xf32>
    %12 = arith.addf %6, %11 : vector<8x128xf32>
    %13 = vector.extract_strided_slice %0 {offsets = [0, 2], sizes = [8, 1], strides = [1, 1]} : vector<8x4xf32> to vector<8x1xf32>
    %14 = vector.extract_strided_slice %1 {offsets = [2, 0], sizes = [1, 128], strides = [1, 1]} : vector<4x128xf32> to vector<1x128xf32>
    %15 = vector.broadcast %13 : vector<8x1xf32> to vector<8x128xf32>
    %16 = vector.broadcast %14 : vector<1x128xf32> to vector<8x128xf32>
    %17 = arith.mulf %15, %16 : vector<8x128xf32>
    %18 = arith.addf %12, %17 : vector<8x128xf32>
    %19 = vector.extract_strided_slice %0 {offsets = [0, 3], sizes = [8, 1], strides = [1, 1]} : vector<8x4xf32> to vector<8x1xf32>
    %20 = vector.extract_strided_slice %1 {offsets = [3, 0], sizes = [1, 128], strides = [1, 1]} : vector<4x128xf32> to vector<1x128xf32>
    %21 = vector.broadcast %19 : vector<8x1xf32> to vector<8x128xf32>
    %22 = vector.broadcast %20 : vector<1x128xf32> to vector<8x128xf32>
    %23 = arith.mulf %21, %22 : vector<8x128xf32>
    %24 = arith.addf %18, %23 : vector<8x128xf32>
    %c0_3 = arith.constant 0 : index
    %c0_4 = arith.constant 0 : index
    %25 = vector.load %arg3[%c0_3, %c0_4] : memref<1x128xf32, #tpu.memory_space<vmem>>, vector<1x128xf32>
    %26 = vector.broadcast %25 : vector<1x128xf32> to vector<8x128xf32>
    %27 = arith.addf %24, %26 : vector<8x128xf32>
    %c0_5 = arith.constant 0 : index
    %c0_6 = arith.constant 0 : index
    %28 = vector.load %arg4[%c0_5, %c0_6] : memref<8x128xf32, #tpu.memory_space<vmem>>, vector<8x128xf32>
    tpu.vector_store %arg4[%c0_5, %c0_6], %27 {strides = array<i32>} : memref<8x128xf32, #tpu.memory_space<vmem>>, vector<8x128xf32>,
    return
  }
  func.func @transform_0(%arg0: i32) -> (i32, i32) {
    %c0_i32 = arith.constant 0 : i32
    %c0_i32_0 = arith.constant 0 : i32
    return %arg0, %c0_i32 : i32, i32
  }
  func.func @transform_1(%arg0: i32) -> (i32, i32) {
    %c0_i32 = arith.constant 0 : i32
    %c0_i32_0 = arith.constant 0 : i32
    %c0_i32_1 = arith.constant 0 : i32
    return %c0_i32, %c0_i32_0 : i32, i32
  }
  func.func @transform_2(%arg0: i32) -> (i32, i32) {
    %c0_i32 = arith.constant 0 : i32
    %c0_i32_0 = arith.constant 0 : i32
    %c0_i32_1 = arith.constant 0 : i32
    return %c0_i32, %c0_i32_0 : i32, i32
  }
  func.func @transform_3(%arg0: i32) -> (i32, i32) {
    %c0_i32 = arith.constant 0 : i32
    %c0_i32_0 = arith.constant 0 : i32
    return %arg0, %c0_i32 : i32, i32
  }
}

</mosaic_0001>

<bundles_post_ra>
// kernel: time_point_embedding.1
= control target key start
LH: loop header
LB: loop body
LE: loop exit
PB: predicated region body
PF: predicated region fallthrough
CT: control target
= control target key end

     0   :  { %v115_v1 = vmov 0   ;;  %v116_v2 = vmov 2   ;;  %s161_s0 = inlined_call_operand.vmem [shape: f32[8,4], index: 0, kind: input, shape index: {}]   ;;  %s162_s1 = inlined_call_operand.vmem [shape: f32[4,128], index: 1, kind: input, shape index: {}]   ;;  %s163_s2 = inlined_call_operand.vmem [shape: f32[1,128], index: 2, kind: input, shape index: {}]   ;;  %s164_s3 = inlined_call_operand.hbm [shape: f32[8,128], index: 3, kind: output, shape index: {}]  }
   0x1   :  { %v15_v0 = vld [vmem:[%s161_s0] sm:$0xff]  ;;  %86 = vset.pattern.permute.xlu0 %v115_v1  ;;  %88 = vset.pattern.permute.xlu1 %v116_v2 }
   0x2   :  { %8 = vsyncpa [#allocation3], 0  ;;  %19 = vperm.xlu0 %86, %v15_v0   ;;  %38 = vperm.xlu1 %88, %v15_v0   ;;  %v117_v3 = vmov 1   ;;  %v118_v4 = vmov 3   ;;  %v22_v5 = vlaneseq  ;;  %v16_v9 = vld [vmem:[%s162_s1] sm:$0xf] }
   0x3   :  { %v80_v26 = vld [vmem:[%s163_s2] ss:$0 sm:$0xff]  ;;  %s119_s1 = smov [#allocation2]  }
   0x4   :  { %v23_v6 = vshrl.u32 %v22_v5, 7  ;;  %s72_s17 = sshll.u32 %s119_s1, 4  ;;  %s73_s17 = int_to_ptr.vmem [resolvable:$true] %s72_s17 }
   0x5   :  { %s91_s18 = scalar_lea.vmem %s73_s17, 128  ;;  %p96_p1 = scmp.lt.s32.totalorder %s73_s17, %s73_s17 }
   0x6   :  { %87 = vset.pattern.permute.xlu0 %v117_v3  ;;  %89 = vset.pattern.permute.xlu1 %v118_v4  ;;  %v24_v7 = vsub.s32 0, %v23_v6  ;;  %v33_v8 = vsub.s32 1, %v23_v6  ;;  %v43_v11 = vsub.s32 2, %v23_v6  ;;  %v53_v13 = vsub.s32 3, %v23_v6  ;;  %p92_p0 = scmp.ne.s32.totalorder %s73_s17, %s91_s18  ;;  %p97_p2 = scmp.lt.s32.totalorder %s91_s18, %s91_s18 }
   0x7   :  { %28 = vperm.xlu0 %87, %v15_v0   ;;  %48 = vperm.xlu1 %89, %v15_v0  }
   0x8   :  { %v25_v14 = vrot.slane %v16_v9, %v24_v7  ;;  %v34_v15 = vrot.slane %v16_v9, %v33_v8  ;;  %v44_v16 = vrot.slane %v16_v9, %v43_v11  ;;  %v54_v17 = vrot.slane %v16_v9, %v53_v13  ;;  %p98_p3 = por %p97_p2, %p96_p1 }
   0xa   :  { %p99_p4 = pnand %p98_p3, %p92_p0 }
   0xb   :  { %90 = vset.pattern.permute.xlu0 %v118_v4 }
  0x81   :  { %v20_v10 = vpop.permute.xlu0 %19  ;;  %v39_v12 = vpop.permute.xlu1 %38 }
  0x82   :  { %v26_v20 = vmul.f32 %v25_v14, %v20_v10  ;;  %v45_v22 = vmul.f32 %v44_v16, %v39_v12 }
  0x86   :  { %v29_v18 = vpop.permute.xlu0 %28  ;;  %v49_v19 = vpop.permute.xlu1 %48 }
  0x87   :  { %v35_v21 = vmul.f32 %v34_v15, %v29_v18  ;;  %v55_v24 = vmul.f32 %v54_v17, %v49_v19 }
  0x89   :  { %v36_v23 = vadd.f32 %v35_v21, %v26_v20 }
  0x8b   :  { %v46_v25 = vadd.f32 %v45_v22, %v36_v23 }
  0x8d   :  { %v56_v27 = vadd.f32 %v55_v24, %v46_v25 }
  0x8f   :  { %v64_v28 = vadd.f32 %v80_v26, %v56_v27 }
  0x91   :  { %65 = vst [vmem:[#allocation2] sm:$0xff] %v64_v28 }
  0x92   :  { %102 = shalt.err (!%p99_p4)
}
  0x93   :  { %s103_s21 = scalar_lea.hbm %s164_s3, 128 }
  0x94   :  { %p104_p5 = scmp.ne.s32.totalorder %s164_s3, %s103_s21  ;;  %p107_p6 = scmp.lt.u32.totalorder %s103_s21, %s164_s3 }
  0x96   :  { %p109_p7 = pnand %p107_p6, %p104_p5 }
  0x98   :  { %112 = shalt.err (!%p109_p7)
}
  0x99   :  { %75 = dma.vmem_to_hbm [thread:$0]  %s73_s17, 128, %s164_s3, [#allocation3]  }
  0x9a   :  { %113 = dma.done.wait [#allocation3], 128  }
  0x9b   :  { %114 = vsyncadd [#allocation3], 4294967168 }
  0x9c   :  { %79 = vsyncpa [#allocation3], 1 }

</bundles_post_ra>
